<compile_context>
chip_gen: v5e
topology: v5e:2x2
jax: 0.10.0
libtpu: 0.0.40
codegen_flags: <defaults>
</compile_context>

<pallas_src>
import functools

import jax
import jax.numpy as jnp
from jax.experimental import pallas as pl
from jax.experimental.pallas import tpu as pltpu

SUBLANE = 8  # f32 sublane width (second-to-last dim granularity)


def _round_up(x, m):
    return (x + m - 1) // m * m


def mlp_kernel(x_ref, w1_ref, b1_ref, w2_ref, b2_ref, w3_ref, b3_ref, o_ref):
    # x arrives as f32 from HBM; cast to the MXU operand dtype in-kernel (no extra HBM pass).
    x = x_ref[...].astype(w1_ref.dtype)
    # layer 1 + ReLU (bf16 MXU operands, f32 accumulate, f32 elementwise)
    h = jnp.dot(x, w1_ref[...], preferred_element_type=jnp.float32) + b1_ref[...]
    h = jnp.maximum(h, 0.0)
    # layer 2 + ReLU
    h = jnp.dot(h.astype(w2_ref.dtype), w2_ref[...],
                preferred_element_type=jnp.float32) + b2_ref[...]
    h = jnp.maximum(h, 0.0)
    # output layer (no activation); only the final store may be narrowed to bf16
    o_ref[...] = (jnp.dot(h.astype(w3_ref.dtype), w3_ref[...],
                          preferred_element_type=jnp.float32)
                  + b3_ref[...]).astype(o_ref.dtype)


def pack_params(params, mxu_dtype=jnp.bfloat16):
    """One-time packing of PyTorch-layout params into kernel layout.

    w: (out, in) -> (in, out), cast to the MXU operand dtype (no padding: Mosaic handles
    the unaligned K=in_dim / N=out_dim matmul dims; padding would only add DMA bytes).
    b: (out,) -> (1, out) float32.
    Call this once at init / after each optimizer step, NOT inside the forward.
    """
    w1, b1, w2, b2, w3, b3 = params
    pack_w = lambda w: jnp.asarray(w).T.astype(mxu_dtype)
    pack_b = lambda b: jnp.asarray(b).reshape(1, -1).astype(jnp.float32)
    return (pack_w(w1), pack_b(b1), pack_w(w2), pack_b(b2), pack_w(w3), pack_b(b3))


@functools.partial(jax.jit, static_argnames=("tile_b", "out_dtype"))
def state_nn_forward(x, packed_params, *, tile_b=2048, out_dtype=jnp.float32):
    """x: [batch, obs_dim + act_dim] float32. packed_params from pack_params().
    Returns [batch, obs_dim] in out_dtype."""
    w1p, b1p, w2p, b2p, w3p, b3p = packed_params
    batch, in_dim = x.shape
    assert w1p.shape[0] == in_dim, (w1p.shape, in_dim)
    hid = w1p.shape[1]
    out_dim = w3p.shape[1]

    # tile_b: multiple of 8 (f32 sublane); clamp to batch, and ensure the grid has >= 2
    # steps whenever batch allows so v7x's two TensorCores both get work.
    max_tile = _round_up(batch, SUBLANE)
    if batch > SUBLANE:
        max_tile = max(SUBLANE, _round_up(pl.cdiv(batch, 2), SUBLANE))
    tile_b = max(SUBLANE, min(_round_up(tile_b, SUBLANE), max_tile))
    grid = (pl.cdiv(batch, tile_b),)  # no batch padding; Pallas clips the last block

    # Constant index_map -> weights/biases are DMA'd once and stay VMEM-resident.
    fixed = lambda shape: pl.BlockSpec(shape, lambda i: (0, 0))

    return pl.pallas_call(
        mlp_kernel,
        out_shape=jax.ShapeDtypeStruct((batch, out_dim), out_dtype),
        grid=grid,
        in_specs=[
            # x tile: last dim == full array dim satisfies the (8,128) rule; f32, unpadded.
            pl.BlockSpec((tile_b, in_dim), lambda i: (i, 0)),
            fixed((in_dim, hid)), fixed((1, hid)),     # W1, b1
            fixed((hid, hid)),    fixed((1, hid)),     # W2, b2
            fixed((hid, out_dim)), fixed((1, out_dim)),  # W3, b3
        ],
        out_specs=pl.BlockSpec((tile_b, out_dim), lambda i: (i, 0)),
        compiler_params=pltpu.CompilerParams(
            dimension_semantics=("parallel",),  # batch tiles -> both TCs on v7x
        ),
    )(x, w1p, b1p, w2p, b2p, w3p, b3p)


# ----------------------------- init / reference -----------------------------

def xavier_uniform(key, fan_out, fan_in, dtype=jnp.float32):
    # Matches torch.nn.init.xavier_uniform_ for a (fan_out, fan_in) weight.
    bound = (6.0 / (fan_in + fan_out)) ** 0.5
    return jax.random.uniform(key, (fan_out, fan_in), dtype, minval=-bound, maxval=bound)


def init_params(key, obs_dim, act_dim, hidden_size, bias_const=0.1):
    # PyTorch nn.Linear layout: w (out, in), b (out,).
    in_dim = obs_dim + act_dim
    k1, k2, k3 = jax.random.split(key, 3)
    w1 = xavier_uniform(k1, hidden_size, in_dim)
    b1 = jnp.full((hidden_size,), bias_const, jnp.float32)
    w2 = xavier_uniform(k2, hidden_size, hidden_size)
    b2 = jnp.full((hidden_size,), bias_const, jnp.float32)
    w3 = xavier_uniform(k3, obs_dim, hidden_size)
    b3 = jnp.full((obs_dim,), bias_const, jnp.float32)
    return (w1, b1, w2, b2, w3, b3)


def ref_forward(x, params, mxu_dtype):
    # Pure-JAX reference with the same MXU-operand dtype as the kernel.
    w1, b1, w2, b2, w3, b3 = params

    def lin(h, w, b):
        return jnp.dot(h.astype(mxu_dtype), w.T.astype(mxu_dtype),
                       preferred_element_type=jnp.float32) + b.astype(jnp.float32)

    h = jnp.maximum(lin(x, w1, b1), 0.0)
    h = jnp.maximum(lin(h, w2, b2), 0.0)
    return lin(h, w3, b3)


if __name__ == "__main__":
    # TODO(synk): PackedSequence unpacking / 3-D reshape in forward() is host-side tensor
    # plumbing done before the kernel; only the 2-D [batch, obs+act] path is implemented.
    obs_dim, act_dim, hidden_size = 17, 6, 256

    key = jax.random.PRNGKey(0)
    key_p, key_x1, key_x2 = jax.random.split(key, 3)
    params = init_params(key_p, obs_dim, act_dim, hidden_size)
    packed = pack_params(params)  # packed once, reused across calls

    # --- small batch (single grid step) ---
    x_small = jax.random.normal(key_x1, (8, obs_dim + act_dim), jnp.float32)
    out_small = jax.block_until_ready(state_nn_forward(x_small, packed))
    assert out_small.shape == (8, obs_dim)
    ref_small = ref_forward(x_small, params, jnp.bfloat16)
    assert jnp.allclose(out_small, ref_small, atol=2e-3, rtol=2e-3), \
        float(jnp.max(jnp.abs(out_small - ref_small)))
    # Sanity check vs full-f32 spec semantics (bf16 MXU operands loosen tolerance).
    ref_small_f32 = ref_forward(x_small, params, jnp.float32)
    assert jnp.allclose(out_small, ref_small_f32, atol=5e-2, rtol=5e-2), \
        float(jnp.max(jnp.abs(out_small - ref_small_f32)))

    # --- larger batch (2 grid steps -> exercises VMEM-resident weights + megacore path) ---
    x_big = jax.random.normal(key_x2, (1024, obs_dim + act_dim), jnp.float32)
    out_big = jax.block_until_ready(state_nn_forward(x_big, packed))
    assert out_big.shape == (1024, obs_dim)
    ref_big = ref_forward(x_big, params, jnp.bfloat16)
    assert jnp.allclose(out_big, ref_big, atol=2e-3, rtol=2e-3), \
        float(jnp.max(jnp.abs(out_big - ref_big)))

    # --- optional bf16 output (halves writeback when the consumer tolerates it) ---
    out_bf16 = jax.block_until_ready(
        state_nn_forward(x_big, packed, out_dtype=jnp.bfloat16))
    assert out_bf16.dtype == jnp.bfloat16
    assert jnp.allclose(out_bf16.astype(jnp.float32), ref_big, atol=2e-2, rtol=2e-2), \
        float(jnp.max(jnp.abs(out_bf16.astype(jnp.float32) - ref_big)))

    print("KERNEL_OK")
</pallas_src>

<mosaic_0001>
module attributes {stable_mosaic.version = 11 : i64} {
  func.func @mlp_kernel(%arg0: i32, %arg1: memref<8x23xf32, #tpu.memory_space<vmem>>, %arg2: memref<23x256xbf16, #tpu.memory_space<vmem>>, %arg3: memref<1x256xf32, #tpu.memory_space<vmem>>, %arg4: memref<256x256xbf16, #tpu.memory_space<vmem>>, %arg5: memref<1x256xf32, #tpu.memory_space<vmem>>, %arg6: memref<256x17xbf16, #tpu.memory_space<vmem>>, %arg7: memref<1x17xf32, #tpu.memory_space<vmem>>, %arg8: memref<8x17xf32, #tpu.memory_space<vmem>>) attributes {dimension_semantics = [#tpu.dimension_semantics<parallel>], iteration_bounds = array<i64: 1>, scalar_prefetch = 0 : i64, scratch_operands = 0 : i64, tpu.core_type = #tpu.core_type<tc>, window_params = [{transform_indices = @transform_0, window_bounds = array<i64: 8, 23>}, {pipeline_mode = #tpu.pipeline_mode<synchronous>, transform_indices = @transform_1, window_bounds = array<i64: 23, 256>}, {pipeline_mode = #tpu.pipeline_mode<synchronous>, transform_indices = @transform_2, window_bounds = array<i64: 1, 256>}, {pipeline_mode = #tpu.pipeline_mode<synchronous>, transform_indices = @transform_3, window_bounds = array<i64: 256, 256>}, {pipeline_mode = #tpu.pipeline_mode<synchronous>, transform_indices = @transform_4, window_bounds = array<i64: 1, 256>}, {pipeline_mode = #tpu.pipeline_mode<synchronous>, transform_indices = @transform_5, window_bounds = array<i64: 256, 17>}, {pipeline_mode = #tpu.pipeline_mode<synchronous>, transform_indices = @transform_6, window_bounds = array<i64: 1, 17>}, {transform_indices = @transform_7, window_bounds = array<i64: 8, 17>}]} {
    %c0 = arith.constant 0 : index
    %c0_0 = arith.constant 0 : index
    %0 = vector.load %arg1[%c0, %c0_0] : memref<8x23xf32, #tpu.memory_space<vmem>>, vector<8x23xf32>
    %1 = arith.truncf %0 : vector<8x23xf32> to vector<8x23xbf16>
    %c0_1 = arith.constant 0 : index
    %c0_2 = arith.constant 0 : index
    %2 = vector.load %arg2[%c0_1, %c0_2] : memref<23x256xbf16, #tpu.memory_space<vmem>>, vector<23x256xbf16>
    %cst = arith.constant dense<0.000000e+00> : vector<8x256xf32>
    %3 = tpu.matmul %1, %2, %cst {dimension_numbers = #tpu.dot_dimension_numbers<[1], [0], [0], [1], [0, 0, 1, 1], [], []>} : vector<8x23xbf16>, vector<23x256xbf16>, vector<8x256xf32> -> vector<8x256xf32>
    %c0_3 = arith.constant 0 : index
    %c0_4 = arith.constant 0 : index
    %4 = vector.load %arg3[%c0_3, %c0_4] : memref<1x256xf32, #tpu.memory_space<vmem>>, vector<1x256xf32>
    %5 = vector.broadcast %4 : vector<1x256xf32> to vector<8x256xf32>
    %6 = arith.addf %3, %5 : vector<8x256xf32>
    %cst_5 = arith.constant 0.000000e+00 : f32
    %7 = vector.broadcast %cst_5 : f32 to vector<8x256xf32>
    %8 = arith.maximumf %6, %7 : vector<8x256xf32>
    %9 = arith.truncf %8 : vector<8x256xf32> to vector<8x256xbf16>
    %c0_6 = arith.constant 0 : index
    %c0_7 = arith.constant 0 : index
    %10 = vector.load %arg4[%c0_6, %c0_7] : memref<256x256xbf16, #tpu.memory_space<vmem>>, vector<256x256xbf16>
    %cst_8 = arith.constant dense<0.000000e+00> : vector<8x256xf32>
    %11 = tpu.matmul %9, %10, %cst_8 {dimension_numbers = #tpu.dot_dimension_numbers<[1], [0], [0], [1], [0, 0, 1, 1], [], []>} : vector<8x256xbf16>, vector<256x256xbf16>, vector<8x256xf32> -> vector<8x256xf32>
    %c0_9 = arith.constant 0 : index
    %c0_10 = arith.constant 0 : index
    %12 = vector.load %arg5[%c0_9, %c0_10] : memref<1x256xf32, #tpu.memory_space<vmem>>, vector<1x256xf32>
    %13 = vector.broadcast %12 : vector<1x256xf32> to vector<8x256xf32>
    %14 = arith.addf %11, %13 : vector<8x256xf32>
    %cst_11 = arith.constant 0.000000e+00 : f32
    %15 = vector.broadcast %cst_11 : f32 to vector<8x256xf32>
    %16 = arith.maximumf %14, %15 : vector<8x256xf32>
    %17 = arith.truncf %16 : vector<8x256xf32> to vector<8x256xbf16>
    %c0_12 = arith.constant 0 : index
    %c0_13 = arith.constant 0 : index
    %18 = vector.load %arg6[%c0_12, %c0_13] : memref<256x17xbf16, #tpu.memory_space<vmem>>, vector<256x17xbf16>
    %cst_14 = arith.constant dense<0.000000e+00> : vector<8x17xf32>
    %19 = tpu.matmul %17, %18, %cst_14 {dimension_numbers = #tpu.dot_dimension_numbers<[1], [0], [0], [1], [0, 0, 1, 1], [], []>} : vector<8x256xbf16>, vector<256x17xbf16>, vector<8x17xf32> -> vector<8x17xf32>
    %c0_15 = arith.constant 0 : index
    %c0_16 = arith.constant 0 : index
    %20 = vector.load %arg7[%c0_15, %c0_16] : memref<1x17xf32, #tpu.memory_space<vmem>>, vector<1x17xf32>
    %21 = vector.broadcast %20 : vector<1x17xf32> to vector<8x17xf32>
    %22 = arith.addf %19, %21 : vector<8x17xf32>
    %c0_17 = arith.constant 0 : index
    %c0_18 = arith.constant 0 : index
    %23 = vector.load %arg8[%c0_17, %c0_18] : memref<8x17xf32, #tpu.memory_space<vmem>>, vector<8x17xf32>
    tpu.vector_store %arg8[%c0_17, %c0_18], %22 {strides = array<i32>} : memref<8x17xf32, #tpu.memory_space<vmem>>, vector<8x17xf32>,
    return
  }
  func.func @transform_0(%arg0: i32) -> (i32, i32) {
    %c0_i32 = arith.constant 0 : i32
    %c0_i32_0 = arith.constant 0 : i32
    return %arg0, %c0_i32 : i32, i32
  }
  func.func @transform_1(%arg0: i32) -> (i32, i32) {
    %c0_i32 = arith.constant 0 : i32
    %c0_i32_0 = arith.constant 0 : i32
    %c0_i32_1 = arith.constant 0 : i32
    return %c0_i32, %c0_i32_0 : i32, i32
  }
  func.func @transform_2(%arg0: i32) -> (i32, i32) {
    %c0_i32 = arith.constant 0 : i32
    %c0_i32_0 = arith.constant 0 : i32
    %c0_i32_1 = arith.constant 0 : i32
    return %c0_i32, %c0_i32_0 : i32, i32
  }
  func.func @transform_3(%arg0: i32) -> (i32, i32) {
    %c0_i32 = arith.constant 0 : i32
    %c0_i32_0 = arith.constant 0 : i32
    %c0_i32_1 = arith.constant 0 : i32
    return %c0_i32, %c0_i32_0 : i32, i32
  }
  func.func @transform_4(%arg0: i32) -> (i32, i32) {
    %c0_i32 = arith.constant 0 : i32
    %c0_i32_0 = arith.constant 0 : i32
    %c0_i32_1 = arith.constant 0 : i32
    return %c0_i32, %c0_i32_0 : i32, i32
  }
  func.func @transform_5(%arg0: i32) -> (i32, i32) {
    %c0_i32 = arith.constant 0 : i32
    %c0_i32_0 = arith.constant 0 : i32
    %c0_i32_1 = arith.constant 0 : i32
    return %c0_i32, %c0_i32_0 : i32, i32
  }
  func.func @transform_6(%arg0: i32) -> (i32, i32) {
    %c0_i32 = arith.constant 0 : i32
    %c0_i32_0 = arith.constant 0 : i32
    %c0_i32_1 = arith.constant 0 : i32
    return %c0_i32, %c0_i32_0 : i32, i32
  }
  func.func @transform_7(%arg0: i32) -> (i32, i32) {
    %c0_i32 = arith.constant 0 : i32
    %c0_i32_0 = arith.constant 0 : i32
    return %arg0, %c0_i32 : i32, i32
  }
}

</mosaic_0001>

<bundles_post_ra>
// kernel: state_nn_forward.1
= control target key start
LH: loop header
LB: loop body
LE: loop exit
PB: predicated region body
PF: predicated region fallthrough
CT: control target
= control target key end

     0   :  { %12 = vsyncpa [#allocation3], 0  ;;  %s981_s0 = inlined_call_operand.vmem [shape: f32[8,23], index: 0, kind: input, shape index: {}]   ;;  %s982_s1 = inlined_call_operand.vmem [shape: bf16[23,256], index: 1, kind: input, shape index: {}]   ;;  %s983_s2 = inlined_call_operand.vmem [shape: f32[1,256], index: 2, kind: input, shape index: {}]   ;;  %s984_s3 = inlined_call_operand.hbm [shape: bf16[256,256], index: 3, kind: input, shape index: {}]   ;;  %s985_s4 = inlined_call_operand.vmem [shape: f32[1,256], index: 4, kind: input, shape index: {}]   ;;  %s986_s5 = inlined_call_operand.vmem [shape: bf16[256,17], index: 5, kind: input, shape index: {}]   ;;  %s987_s6 = inlined_call_operand.vmem [shape: f32[1,17], index: 6, kind: input, shape index: {}]   ;;  %s988_s7 = inlined_call_operand.hbm [shape: f32[8,17], index: 7, kind: output, shape index: {}]  }
   0x1   :  { %13 = vsyncpa [#allocation4], 0  ;;  %s24_s26 = sshll.u32 %s984_s3, 4  ;;  %s855_s27 = smov [#allocation2]   ;;  %s25_s26 = int_to_ptr.hbm [resolvable:$true] %s24_s26 }
   0x2   :  { %s26_s28 = sshll.u32 %s855_s27, 4  ;;  %s856_s29 = smov 128   ;;  %s27_s28 = int_to_ptr.vmem [resolvable:$true] %s26_s28 }
   0x3   :  { %s857_s30 = smov 8  }
   0x4   :  { %32 = dma.hbm_to_vmem [thread:$0]  %s25_s26, 4096, %s27_s28, [#allocation3], %s856_s29, %s856_s29, %s857_s30  }
   0x5   :  { %851 = dma.done.wait [#allocation3], 4096  }
   0x6   :  { %852 = vsyncadd [#allocation3], 4294963200  ;;  %vm74_vm0 = vcmask 1042432   ;;  %vm75_vm1 = vcmask 1043456   ;;  %v858_v0 = vmov 65535   ;;  %v48_v2 = vld [vmem:[%s982_s1 + $0x10] sm:$0xff] }
   0x7   :  { %v76_v1 = vsel %vm74_vm0, 4294967295, %v858_v0  ;;  %v62_v3 = vunpack.c.l.b16 %v48_v2  ;;  %v63_v5 = vunpack.c.h.b16 %v48_v2  ;;  %v547_v6 = vld [vmem:[%s982_s1] sm:$0xf]  ;;  %v748_v7 = vld [vmem:[%s982_s1 + $0x4] sm:$0xf0]  ;;  %vm70_vm2 = vcmask 187392  }
   0x8   :  { %v77_v4 = vsel %vm75_vm1, %v76_v1, 0  ;;  %v747_v8 = vld [vmem:[%s982_s1 + $0x4] sm:$0xf]  ;;  %v549_v9 = vld [vmem:[%s982_s1 + $0x8] sm:$0xf0]  ;;  %v548_v30 = vor.u32 %v748_v7, %v547_v6  ;;  %s859_s26 = smov [#allocation5]  }
   0x9   :  { %v613_v10 = vld [vmem:[#allocation2 + $0x70] sm:$0xf]  ;;  %v764_v11 = vld [vmem:[#allocation2 + $0x74] sm:$0xf0]  ;;  %v66_v13 = vpack.c.b16 %v62_v3, %v62_v3  ;;  %v67_v14 = vpack.c.b16 %v63_v5, %v63_v5  ;;  %v763_v17 = vld [vmem:[#allocation2 + $0x74] sm:$0xf]  ;;  %v552_v31 = vor.u32 %v747_v8, %v549_v9 }
   0xa   :  { %v677_v12 = vld [vmem:[#allocation2 + $0xf0] sm:$0xf]  ;;  %v614_v15 = vor.u32 %v764_v11, %v613_v10  ;;  %v780_v16 = vld [vmem:[#allocation2 + $0xf4] sm:$0xf0]  ;;  %v615_v18 = vld [vmem:[#allocation2 + $0x78] sm:$0xf0] }
   0xb   :  { %v678_v19 = vor.u32 %v780_v16, %v677_v12  ;;  %v779_v20 = vld [vmem:[#allocation2 + $0xf4] sm:$0xf]  ;;  %v679_v21 = vld [vmem:[#allocation2 + $0xf8] sm:$0xf0]  ;;  %v605_v22 = vld [vmem:[#allocation2 + $0x60] sm:$0xf]  ;;  %v79_v23 = vand.u32 %v77_v4, %v66_v13  ;;  %v82_v24 = vand.u32 %v77_v4, %v67_v14  ;;  %v618_v35 = vor.u32 %v763_v17, %v615_v18 }
   0xc   :  { %312 = vmatpush.bf16.msra.mxu2 %v614_v15  ;;  %v762_v25 = vld [vmem:[#allocation2 + $0x64] sm:$0xf0]  ;;  %v669_v26 = vld [vmem:[#allocation2 + $0xe0] sm:$0xf]  ;;  %v597_v33 = vld [vmem:[#allocation2 + $0x50] sm:$0xf]  ;;  %v682_v36 = vor.u32 %v779_v20, %v679_v21 }
   0xd   :  { %v778_v27 = vld [vmem:[#allocation2 + $0xe4] sm:$0xf0]  ;;  %325 = vmatpush.bf16.msra.mxu3 %v678_v19  ;;  %v606_v28 = vor.u32 %v762_v25, %v605_v22  ;;  %90 = vmatpush.bf16.msra.mxu0 %v79_v23  ;;  %v44_v32 = vld [vmem:[%s981_s0] sm:$0xff]  ;;  %v760_v34 = vld [vmem:[#allocation2 + $0x54] sm:$0xf0]  ;;  %s533_s27 = sshll.u32 %s859_s26, 4  ;;  %s534_s27 = int_to_ptr.vmem [resolvable:$true] %s533_s27 }
   0xe   :  { %v670_v29 = vor.u32 %v778_v27, %v669_v26  ;;  %103 = vmatpush.bf16.msra.mxu1 %v82_v24  ;;  %v761_v37 = vld [vmem:[#allocation2 + $0x64] sm:$0xf]  ;;  %v661_v38 = vld [vmem:[#allocation2 + $0xd0] sm:$0xf]  ;;  %v776_v39 = vld [vmem:[#allocation2 + $0xd4] sm:$0xf0]  ;;  %v598_v43 = vor.u32 %v760_v34, %v597_v33  ;;  %v45_v44 = vpack.c.bf16 %v44_v32, %v44_v32 }
   0xf   :  { %v607_v40 = vld [vmem:[#allocation2 + $0x68] sm:$0xf0]  ;;  %v777_v41 = vld [vmem:[#allocation2 + $0xe4] sm:$0xf]  ;;  %v589_v45 = vld [vmem:[#allocation2 + $0x40] sm:$0xf]  ;;  %v662_v47 = vor.u32 %v776_v39, %v661_v38 }
  0x10   :  { %313 = vmatpush.bf16.msra.mxu2 %v606_v28  ;;  %v671_v42 = vld [vmem:[#allocation2 + $0xe8] sm:$0xf0]  ;;  %v758_v46 = vld [vmem:[#allocation2 + $0x44] sm:$0xf0]  ;;  %v610_v48 = vor.u32 %v761_v37, %v607_v40  ;;  %v759_v50 = vld [vmem:[#allocation2 + $0x54] sm:$0xf] }
  0x11   :  { %326 = vmatpush.bf16.msra.mxu3 %v670_v29  ;;  %91 = vmatpush.bf16.msra.mxu0 %v548_v30  ;;  %v674_v49 = vor.u32 %v777_v41, %v671_v42  ;;  %v653_v51 = vld [vmem:[#allocation2 + $0xc0] sm:$0xf]  ;;  %v774_v52 = vld [vmem:[#allocation2 + $0xc4] sm:$0xf0]  ;;  %v599_v53 = vld [vmem:[#allocation2 + $0x58] sm:$0xf0]  ;;  %v590_v56 = vor.u32 %v758_v46, %v589_v45 }
  0x12   :  { %104 = vmatpush.bf16.msra.mxu1 %v552_v31  ;;  %v775_v54 = vld [vmem:[#allocation2 + $0xd4] sm:$0xf]  ;;  %v663_v55 = vld [vmem:[#allocation2 + $0xd8] sm:$0xf0]  ;;  %v581_v57 = vld [vmem:[#allocation2 + $0x30] sm:$0xf]  ;;  %v654_v59 = vor.u32 %v774_v52, %v653_v51  ;;  %v602_v60 = vor.u32 %v759_v50, %v599_v53 }
  0x13   :  { %v756_v58 = vld [vmem:[#allocation2 + $0x34] sm:$0xf0]  ;;  %v666_v61 = vor.u32 %v775_v54, %v663_v55  ;;  %v757_v62 = vld [vmem:[#allocation2 + $0x44] sm:$0xf]  ;;  %v645_v63 = vld [vmem:[#allocation2 + $0xb0] sm:$0xf] }
  0x14   :  { %314 = vmatpush.bf16.msra.mxu2 %v598_v43  ;;  %553 = vmatmul.msk.bf16.vlgmr.msra.gmra.mxu0 %vm70_vm2, %v45_v44  ;;  %v772_v0 = vld [vmem:[#allocation2 + $0xb4] sm:$0xf0]  ;;  %v591_v1 = vld [vmem:[#allocation2 + $0x48] sm:$0xf0]  ;;  %v773_v2 = vld [vmem:[#allocation2 + $0xc4] sm:$0xf]  ;;  %v582_v4 = vor.u32 %v756_v58, %v581_v57 }
  0x15   :  { %338 = vmatpush.bf16.msrb.mxu0 %v618_v35  ;;  %554 = vmatmul.msk.bf16.vlgmr.msra.gmra.mxu1 %vm70_vm2, %v45_v44  ;;  %v655_v3 = vld [vmem:[#allocation2 + $0xc8] sm:$0xf0]  ;;  %v573_v5 = vld [vmem:[#allocation2 + $0x20] sm:$0xf]  ;;  %v754_v6 = vld [vmem:[#allocation2 + $0x24] sm:$0xf0]  ;;  %v646_v7 = vor.u32 %v772_v0, %v645_v63  ;;  %v594_v8 = vor.u32 %v757_v62, %v591_v1 }
  0x16   :  { %351 = vmatpush.bf16.msrb.mxu1 %v682_v36  ;;  %327 = vmatpush.bf16.msra.mxu3 %v662_v47  ;;  %v658_v9 = vor.u32 %v773_v2, %v655_v3  ;;  %v755_v10 = vld [vmem:[#allocation2 + $0x34] sm:$0xf]  ;;  %v637_v11 = vld [vmem:[#allocation2 + $0xa0] sm:$0xf]  ;;  %v770_v12 = vld [vmem:[#allocation2 + $0xa4] sm:$0xf0]  ;;  %v574_v16 = vor.u32 %v754_v6, %v573_v5 }
  0x17   :  { %v583_v13 = vld [vmem:[#allocation2 + $0x38] sm:$0xf0]  ;;  %v771_v14 = vld [vmem:[#allocation2 + $0xb4] sm:$0xf]  ;;  %v638_v17 = vor.u32 %v770_v12, %v637_v11  ;;  %v753_v20 = vld [vmem:[#allocation2 + $0x24] sm:$0xf] }
  0x18   :  { %315 = vmatpush.bf16.msra.mxu2 %v590_v56  ;;  %v647_v15 = vld [vmem:[#allocation2 + $0xb8] sm:$0xf0]  ;;  %v586_v18 = vor.u32 %v755_v10, %v583_v13  ;;  %v575_v21 = vld [vmem:[#allocation2 + $0x28] sm:$0xf0]  ;;  %v769_v22 = vld [vmem:[#allocation2 + $0xa4] sm:$0xf] }
  0x19   :  { %339 = vmatpush.bf16.msrb.mxu0 %v610_v48  ;;  %v650_v19 = vor.u32 %v771_v14, %v647_v15  ;;  %v639_v23 = vld [vmem:[#allocation2 + $0xa8] sm:$0xf0]  ;;  %v578_v24 = vor.u32 %v753_v20, %v575_v21  ;;  %v565_v26 = vld [vmem:[#allocation2 + $0x10] sm:$0xf]  ;;  %v752_v27 = vld [vmem:[#allocation2 + $0x14] sm:$0xf0] }
  0x1a   :  { %352 = vmatpush.bf16.msrb.mxu1 %v674_v49  ;;  %328 = vmatpush.bf16.msra.mxu3 %v654_v59  ;;  %v642_v25 = vor.u32 %v769_v22, %v639_v23  ;;  %v629_v28 = vld [vmem:[#allocation2 + $0x90] sm:$0xf]  ;;  %v566_v29 = vor.u32 %v752_v27, %v565_v26  ;;  %v768_v30 = vld [vmem:[#allocation2 + $0x94] sm:$0xf0]  ;;  %v751_v31 = vld [vmem:[#allocation2 + $0x14] sm:$0xf] }
  0x1b   :  { %v567_v32 = vld [vmem:[#allocation2 + $0x18] sm:$0xf0]  ;;  %v630_v33 = vor.u32 %v768_v30, %v629_v28  ;;  %v767_v35 = vld [vmem:[#allocation2 + $0x94] sm:$0xf]  ;;  %v557_v38 = vld [vmem:[#allocation2] sm:$0xf] }
  0x1c   :  { %316 = vmatpush.bf16.msra.mxu2 %v582_v4  ;;  %v570_v34 = vor.u32 %v751_v31, %v567_v32  ;;  %v631_v36 = vld [vmem:[#allocation2 + $0x98] sm:$0xf0]  ;;  %v750_v39 = vld [vmem:[#allocation2 + $0x4] sm:$0xf0]  ;;  %v621_v40 = vld [vmem:[#allocation2 + $0x80] sm:$0xf] }
  0x1d   :  { %340 = vmatpush.bf16.msrb.mxu0 %v602_v60  ;;  %v634_v37 = vor.u32 %v767_v35, %v631_v36  ;;  %v558_v41 = vor.u32 %v750_v39, %v557_v38  ;;  %v766_v42 = vld [vmem:[#allocation2 + $0x84] sm:$0xf0]  ;;  %v749_v43 = vld [vmem:[#allocation2 + $0x4] sm:$0xf]  ;;  %v559_v44 = vld [vmem:[#allocation2 + $0x8] sm:$0xf0] }
  0x1e   :  { %353 = vmatpush.bf16.msrb.mxu1 %v666_v61  ;;  %329 = vmatpush.bf16.msra.mxu3 %v646_v7  ;;  %v622_v45 = vor.u32 %v766_v42, %v621_v40  ;;  %v562_v46 = vor.u32 %v749_v43, %v559_v44  ;;  %v765_v47 = vld [vmem:[#allocation2 + $0x84] sm:$0xf]  ;;  %v623_v48 = vld [vmem:[#allocation2 + $0x88] sm:$0xf0]  ;;  %v796_v50 = vld [vmem:[%s986_s5 + $0x78] sm:$0xff]  ;;  %s535_s30 = sshll.u32 %s988_s7, 4  ;;  %s536_s30 = int_to_ptr.hbm [resolvable:$true] %s535_s30 }
  0x1f   :  { %v626_v49 = vor.u32 %v765_v47, %v623_v48  ;;  %v788_v51 = vld [vmem:[%s986_s5 + $0x38] sm:$0xff]  ;;  %v795_v52 = vld [vmem:[%s986_s5 + $0x70] sm:$0xff]  ;;  %v794_v54 = vld [vmem:[%s986_s5 + $0x68] sm:$0xff]  ;;  %vm526_vm3 = vcmask 138240  }
  0x20   :  { %317 = vmatpush.bf16.msra.mxu2 %v574_v16  ;;  %v787_v53 = vld [vmem:[%s986_s5 + $0x30] sm:$0xff]  ;;  %v786_v55 = vld [vmem:[%s986_s5 + $0x28] sm:$0xff]  ;;  %v793_v56 = vld [vmem:[%s986_s5 + $0x60] sm:$0xff] }
  0x21   :  { %341 = vmatpush.bf16.msrb.mxu0 %v594_v8  ;;  %v785_v57 = vld [vmem:[%s986_s5 + $0x20] sm:$0xff]  ;;  %v792_v58 = vld [vmem:[%s986_s5 + $0x58] sm:$0xff]  ;;  %v791_v60 = vld [vmem:[%s986_s5 + $0x50] sm:$0xff] }
  0x22   :  { %354 = vmatpush.bf16.msrb.mxu1 %v658_v9  ;;  %330 = vmatpush.bf16.msra.mxu3 %v638_v17  ;;  %v49_v59 = vld [vmem:[%s983_s2] sm:$0x3]  ;;  %v784_v9 = vld [vmem:[%s986_s5 + $0x18] sm:$0xff]  ;;  %v790_v10 = vld [vmem:[%s986_s5 + $0x48] sm:$0xff] }
  0x23   :  { %v51_v61 = vperm.slane %v49_v59, 0  ;;  %v52_v62 = vperm.slane %v49_v59, 1  ;;  %v783_v11 = vld [vmem:[%s986_s5 + $0x10] sm:$0xff]  ;;  %v789_v12 = vld [vmem:[%s986_s5 + $0x40] sm:$0xff]  ;;  %v782_v13 = vld [vmem:[%s986_s5 + $0x8] sm:$0xff] }
  0x24   :  { %318 = vmatpush.bf16.msra.mxu2 %v566_v29  ;;  %v781_v14 = vld [vmem:[%s986_s5] sm:$0xff] }
  0x25   :  { %342 = vmatpush.bf16.msrb.mxu0 %v586_v18  ;;  %v146_v15 = vld [vmem:[%s985_s4] sm:$0x3] }
  0x26   :  { %355 = vmatpush.bf16.msrb.mxu1 %v650_v19  ;;  %331 = vmatpush.bf16.msra.mxu3 %v630_v33  ;;  %v149_v16 = vperm.slane %v146_v15, 1  ;;  %v148_v20 = vperm.slane %v146_v15, 0  ;;  %v802_v35 = vld [vmem:[%s987_s6] ss:$0 sm:$0xff] }
  0x28   :  { %319 = vmatpush.bf16.msra.mxu2 %v558_v41 }
  0x29   :  { %343 = vmatpush.bf16.msrb.mxu0 %v578_v24 }
  0x2a   :  { %356 = vmatpush.bf16.msrb.mxu1 %v642_v25  ;;  %332 = vmatpush.bf16.msra.mxu3 %v622_v45 }
  0x2c   :  { %500 = vmatpush.bf16.msrb.mxu2 %v788_v51 }
  0x2d   :  { %344 = vmatpush.bf16.msrb.mxu0 %v570_v34 }
  0x2e   :  { %357 = vmatpush.bf16.msrb.mxu1 %v634_v37  ;;  %513 = vmatpush.bf16.msrb.mxu3 %v796_v50 }
  0x30   :  { %501 = vmatpush.bf16.msrb.mxu2 %v787_v53 }
  0x31   :  { %345 = vmatpush.bf16.msrb.mxu0 %v562_v46 }
  0x32   :  { %358 = vmatpush.bf16.msrb.mxu1 %v626_v49  ;;  %514 = vmatpush.bf16.msrb.mxu3 %v795_v52 }
  0x34   :  { %502 = vmatpush.bf16.msrb.mxu2 %v786_v55 }
  0x36   :  { %515 = vmatpush.bf16.msrb.mxu3 %v794_v54 }
  0x38   :  { %503 = vmatpush.bf16.msrb.mxu2 %v785_v57 }
  0x3a   :  { %516 = vmatpush.bf16.msrb.mxu3 %v793_v56 }
  0x3c   :  { %504 = vmatpush.bf16.msrb.mxu2 %v784_v9 }
  0x3e   :  { %517 = vmatpush.bf16.msrb.mxu3 %v792_v58 }
  0x40   :  { %505 = vmatpush.bf16.msrb.mxu2 %v783_v11 }
  0x42   :  { %518 = vmatpush.bf16.msrb.mxu3 %v791_v60 }
  0x44   :  { %506 = vmatpush.bf16.msrb.mxu2 %v782_v13 }
  0x46   :  { %519 = vmatpush.bf16.msrb.mxu3 %v790_v10 }
  0x48   :  { %507 = vmatpush.bf16.msrb.mxu2 %v781_v14 }
  0x4a   :  { %520 = vmatpush.bf16.msrb.mxu3 %v789_v12 }
  0x91   :  { %v93_v63 = vpop.f32.mrf.mxu0 }
  0x92   :  { %v106_v0 = vpop.f32.mrf.mxu1  ;;  %v94_v1 = vadd.f32 %v93_v63, %v51_v61 }
  0x93   :  { %v107_v2 = vadd.f32 %v106_v0, %v52_v62 }
  0x94   :  { %v110_v3 = vmax.f32 %v94_v1, 0.0 }
  0x95   :  { %v111_v4 = vmax.f32 %v107_v2, 0.0 }
  0x96   :  { %v112_v5 = vpack.c.bf16 %v110_v3, %v110_v3 }
  0x97   :  { %v113_v6 = vpack.c.bf16 %v111_v4, %v111_v4 }
  0x98   :  { %320 = vmatmul.bf16.vlgmr.msra.gmra.mxu2 %v112_v5  ;;  %346 = vmatmul.bf16.vlgmr.msrb.gmra.mxu0 %v112_v5 }
  0x99   :  { %333 = vmatmul.bf16.vlgmr.msra.gmra.mxu3 %v113_v6  ;;  %359 = vmatmul.bf16.vlgmr.msrb.gmra.mxu1 %v113_v6  ;;  %v95_v7 = vpop.f32.mrf.mxu0 }
  0x9a   :  { %v108_v8 = vpop.f32.mrf.mxu1 }
 0x115   :  { %v347_v17 = vpop.f32.mrf.mxu0 }
 0x116   :  { %v360_v18 = vpop.f32.mrf.mxu1  ;;  %v348_v19 = vadd.f32 %v347_v17, %v149_v16 }
 0x118   :  { %v361_v21 = vadd.f32 %v360_v18, %v348_v19 }
 0x11a   :  { %v365_v22 = vmax.f32 %v361_v21, 0.0 }
 0x11b   :  { %v321_v23 = vpop.f32.mrf.mxu2 }
 0x11c   :  { %v334_v24 = vpop.f32.mrf.mxu3  ;;  %v322_v25 = vadd.f32 %v321_v23, %v148_v20  ;;  %v367_v26 = vpack.c.bf16 %v365_v22, %v365_v22 }
 0x11d   :  { %v349_v28 = vpop.f32.mrf.mxu0 }
 0x11e   :  { %v335_v27 = vadd.f32 %v334_v24, %v322_v25  ;;  %v362_v29 = vpop.f32.mrf.mxu1  ;;  %521 = vmatmul.bf16.vlgmr.msrb.gmra.mxu3 %v367_v26 }
 0x120   :  { %v364_v30 = vmax.f32 %v335_v27, 0.0 }
 0x122   :  { %v366_v31 = vpack.c.bf16 %v364_v30, %v364_v30 }
 0x123   :  { %v323_v32 = vpop.f32.mrf.mxu2 }
 0x124   :  { %v336_v33 = vpop.f32.mrf.mxu3  ;;  %508 = vmatmul.bf16.vlgmr.msrb.gmra.mxu2 %v366_v31 }
 0x1a1   :  { %v522_v34 = vpop.f32.mrf.mxu3 }
 0x1a7   :  { %v509_v36 = vpop.f32.mrf.mxu2 }
 0x1a8   :  { %v510_v37 = vadd.f32 %v802_v35, %v509_v36 }
 0x1a9   :  { %v524_v39 = vpop.f32.mrf.mxu3 }
 0x1aa   :  { %v523_v38 = vadd.f32 %v522_v34, %v510_v37 }
 0x1ac   :  { %527 = vst.msk [vmem:[#allocation5] sm:$0xff] %vm526_vm3, %v523_v38 }
 0x1ad   :  { %538 = dma.vmem_to_hbm [thread:$0]  %s534_s27, 128, %s536_s30, [#allocation4]  }
 0x1af   :  { %v511_v40 = vpop.f32.mrf.mxu2 }
 0x1b0   :  { %853 = dma.done.wait [#allocation4], 128  }
 0x1b1   :  { %854 = vsyncadd [#allocation4], 4294967168 }
 0x1b2   :  { %543 = vsyncpa [#allocation3], 1 }
 0x1b3   :  { %544 = vsyncpa [#allocation4], 1 }

</bundles_post_ra>
